<compile_context>
chip_gen: v7x
topology: tpu7x:2x2x1
jax: 0.10.0
libtpu: 0.0.40
codegen_flags: <defaults>
</compile_context>

<pallas_src>
import functools

import jax
import jax.numpy as jnp
from jax import lax
from jax.experimental import pallas as pl
from jax.experimental.pallas import tpu as pltpu


def _round_up(x, m):
    return (x + m - 1) // m * m


def rnn_kernel(x_proj_ref, lens_ref, w_hh_t_ref, w_fc_t_ref, b_fc_ref,
               out_ref, *, valid_out):
    """Masked Elman recurrence + Linear + LogSoftmax on lane-padded shapes.

    x_proj_ref: (T, Bp, Hp) f32   seqs @ W_ih^T + (b_ih + b_hh), precomputed
    lens_ref  : (Bp, 1)     i32   sequence lengths (0 for padded batch rows)
    w_hh_t_ref: (Hp, Hp)    f32   hidden-to-hidden weight, pre-transposed
    w_fc_t_ref: (Hp, Op)    f32   fc weight, pre-transposed
    b_fc_ref  : (1, Op)     f32   fc bias
    out_ref   : (Bp, Op)    f32   log-probabilities (valid block = [:B, :valid_out])
    """
    T, Bp, Hp = x_proj_ref.shape
    Op = out_ref.shape[1]

    # Hoist loop-invariant loads out of the serial recurrence chain.
    w_hh_t = w_hh_t_ref[...]
    lens = lens_ref[...]                                   # (Bp, 1) int32

    def step(t, h_prev):
        # Only one MXU op on the critical path: h_{t-1} @ W_hh^T.
        gate = x_proj_ref[t] + jnp.dot(h_prev, w_hh_t,
                                       preferred_element_type=jnp.float32)
        h_new = jnp.tanh(gate)
        # pack_padded_sequence semantics: stop updating once t >= len[b], so h
        # ends up holding the hidden state at each sequence's last valid step.
        return jnp.where(lens > t, h_new, h_prev)

    h0 = jnp.zeros((Bp, Hp), jnp.float32)
    # Hidden state lives in the carry (vregs); fully unrolled so the scheduler
    # can overlap the MXU push of step t with the VPU tanh/select of step t-1.
    h = lax.fori_loop(0, T, step, h0, unroll=True)

    # TODO(synk): nn.Dropout(p=0.5) is identity in eval mode (implemented); a
    # train-mode variant would need pltpu.prng_* masking here.

    logits = (jnp.dot(h, w_fc_t_ref[...], preferred_element_type=jnp.float32)
              + b_fc_ref[...])                              # (Bp, Op)

    # Mask lane-padding columns so they do not perturb the LogSoftmax.
    col = lax.broadcasted_iota(jnp.int32, (Bp, Op), 1)
    logits = jnp.where(col < valid_out, logits, -1e30)

    m = jnp.max(logits, axis=1, keepdims=True)
    shifted = logits - m
    lse = jnp.log(jnp.sum(jnp.exp(shifted), axis=1, keepdims=True))
    out_ref[...] = shifted - lse


@jax.jit
def rnn_forward(seqs, seq_lens, w_ih, w_hh, b_ih, b_hh, w_fc, b_fc):
    """seqs: (T, B, I) f32 padded time-major, seq_lens: (B,) int."""
    T, B, I = seqs.shape
    H = w_hh.shape[0]
    O = w_fc.shape[0]

    # Sublane/lane padding: B -> multiple of 8, H/O -> multiples of 128.
    Bp = _round_up(B, 8)
    Hp = _round_up(H, 128)
    Op = _round_up(O, 128)

    # Hoisted input projection: one large matmul instead of T tiny matmuls on
    # the serial recurrence path; both RNN biases fused in.
    x_proj = jnp.einsum('tbi,hi->tbh', seqs, w_ih) + (b_ih + b_hh)   # (T, B, H)
    x_proj = jnp.pad(x_proj, ((0, 0), (0, Bp - B), (0, Hp - H)))

    w_hh_t = jnp.pad(jnp.transpose(w_hh), ((0, Hp - H), (0, Hp - H)))
    w_fc_t = jnp.pad(jnp.transpose(w_fc), ((0, Hp - H), (0, Op - O)))
    b_fc_p = jnp.pad(b_fc, (0, Op - O)).reshape(1, Op)
    lens_p = jnp.pad(seq_lens.astype(jnp.int32), (0, Bp - B)).reshape(Bp, 1)

    flops = 2 * T * Bp * Hp * Hp + 2 * Bp * Hp * Op
    transcendentals = T * Bp * Hp + Bp * Op
    bytes_accessed = 4 * (x_proj.size + w_hh_t.size + w_fc_t.size
                          + b_fc_p.size + lens_p.size + Bp * Op)

    vmem = pl.BlockSpec(memory_space=pltpu.MemorySpace.VMEM)
    out_p = pl.pallas_call(
        functools.partial(rnn_kernel, valid_out=O),
        out_shape=jax.ShapeDtypeStruct((Bp, Op), jnp.float32),
        in_specs=[vmem] * 5,
        out_specs=vmem,
        cost_estimate=pl.CostEstimate(flops=flops,
                                      transcendentals=transcendentals,
                                      bytes_accessed=bytes_accessed),
    )(x_proj, lens_p, w_hh_t, w_fc_t, b_fc_p)

    return out_p[:B, :O]


def rnn_reference(seqs, seq_lens, w_ih, w_hh, b_ih, b_hh, w_fc, b_fc):
    """Pure-JAX reference matching the PyTorch module (eval mode)."""
    T, B, _ = seqs.shape
    H = w_hh.shape[0]
    h = jnp.zeros((B, H), jnp.float32)
    for t in range(T):
        h_new = jnp.tanh(seqs[t] @ w_ih.T + b_ih + h @ w_hh.T + b_hh)
        h = jnp.where((seq_lens > t)[:, None], h_new, h)
    logits = h @ w_fc.T + b_fc
    return jax.nn.log_softmax(logits, axis=1)


if __name__ == "__main__":
    # Small shapes consistent with the module: T=8, B=4, input=16, hidden=32, out=8.
    T, B, I, H, O = 8, 4, 16, 32, 8

    key = jax.random.PRNGKey(0)
    k_seq, k_wih, k_whh, k_bih, k_bhh, k_wfc, k_bfc = jax.random.split(key, 7)

    # PyTorch-style uniform(-1/sqrt(H), 1/sqrt(H)) init.
    bound = 1.0 / (H ** 0.5)
    w_ih = jax.random.uniform(k_wih, (H, I), jnp.float32, -bound, bound)
    w_hh = jax.random.uniform(k_whh, (H, H), jnp.float32, -bound, bound)
    b_ih = jax.random.uniform(k_bih, (H,), jnp.float32, -bound, bound)
    b_hh = jax.random.uniform(k_bhh, (H,), jnp.float32, -bound, bound)
    w_fc = jax.random.uniform(k_wfc, (O, H), jnp.float32, -bound, bound)
    b_fc = jax.random.uniform(k_bfc, (O,), jnp.float32, -bound, bound)

    # Padded sequences, time-major (T, B, I); lengths sorted descending
    # (pack_padded_sequence default enforce_sorted=True).
    seq_lens = jnp.array([8, 6, 5, 3], dtype=jnp.int32)
    seqs = jax.random.normal(k_seq, (T, B, I), jnp.float32)
    t_idx = jnp.arange(T)[:, None, None]
    seqs = jnp.where(t_idx < seq_lens[None, :, None], seqs, 0.0)

    out = rnn_forward(seqs, seq_lens, w_ih, w_hh, b_ih, b_hh, w_fc, b_fc)
    out = jax.block_until_ready(out)

    assert out.shape == (B, O)
    # log-softmax rows must exponentiate and sum to ~1
    assert jnp.allclose(jnp.sum(jnp.exp(out), axis=1), 1.0, atol=1e-5)
    # match the pure-JAX reference of the PyTorch forward
    ref = rnn_reference(seqs, seq_lens, w_ih, w_hh, b_ih, b_hh, w_fc, b_fc)
    assert jnp.allclose(out, ref, atol=1e-4, rtol=1e-4), (
        float(jnp.max(jnp.abs(out - ref))))
    print("KERNEL_OK")
</pallas_src>

<mosaic_0001>
module attributes {stable_mosaic.version = 11 : i64} {
  func.func @rnn_kernel(%arg0: memref<8x8x128xf32, #tpu.memory_space<vmem>>, %arg1: memref<8x1xi32, #tpu.memory_space<vmem>>, %arg2: memref<128x128xf32, #tpu.memory_space<vmem>>, %arg3: memref<128x128xf32, #tpu.memory_space<vmem>>, %arg4: memref<1x128xf32, #tpu.memory_space<vmem>>, %arg5: memref<8x128xf32, #tpu.memory_space<vmem>>) attributes {dimension_semantics = [], scalar_prefetch = 0 : i64, scratch_operands = 0 : i64, tpu.core_type = #tpu.core_type<tc>} {
    %c0 = arith.constant 0 : index
    %c0_0 = arith.constant 0 : index
    %0 = vector.load %arg2[%c0, %c0_0] : memref<128x128xf32, #tpu.memory_space<vmem>>, vector<128x128xf32>
    %c0_1 = arith.constant 0 : index
    %c0_2 = arith.constant 0 : index
    %1 = vector.load %arg1[%c0_1, %c0_2] : memref<8x1xi32, #tpu.memory_space<vmem>>, vector<8x1xi32>
    %cst = arith.constant 0.000000e+00 : f32
    %2 = vector.broadcast %cst : f32 to vector<8x128xf32>
    %c0_i32 = arith.constant 0 : i32
    %3 = arith.index_cast %c0_i32 : i32 to index
    %c0_3 = arith.constant 0 : index
    %c0_4 = arith.constant 0 : index
    %4 = vector.load %arg0[%3, %c0_3, %c0_4] : memref<8x8x128xf32, #tpu.memory_space<vmem>>, vector<1x8x128xf32>
    %5 = vector.shape_cast %4 : vector<1x8x128xf32> to vector<8x128xf32>
    %cst_5 = arith.constant dense<0.000000e+00> : vector<8x128xf32>
    %6 = tpu.matmul %2, %0, %cst_5 {dimension_numbers = #tpu.dot_dimension_numbers<[1], [0], [0], [1], [0, 0, 1, 1], [], []>} : vector<8x128xf32>, vector<128x128xf32>, vector<8x128xf32> -> vector<8x128xf32>
    %7 = arith.addf %5, %6 : vector<8x128xf32>
    %8 = math.tanh %7 : vector<8x128xf32>
    %9 = vector.broadcast %c0_i32 : i32 to vector<8x1xi32>
    %10 = arith.cmpi sgt, %1, %9 : vector<8x1xi32>
    %11 = vector.shape_cast %10 : vector<8x1xi1> to vector<8x1xi1>
    %12 = vector.broadcast %11 : vector<8x1xi1> to vector<8x128xi1>
    %13 = arith.select %12, %8, %2 : vector<8x128xi1>, vector<8x128xf32>
    %c1_i32 = arith.constant 1 : i32
    %14 = arith.index_cast %c1_i32 : i32 to index
    %c0_6 = arith.constant 0 : index
    %c0_7 = arith.constant 0 : index
    %15 = vector.load %arg0[%14, %c0_6, %c0_7] : memref<8x8x128xf32, #tpu.memory_space<vmem>>, vector<1x8x128xf32>
    %16 = vector.shape_cast %15 : vector<1x8x128xf32> to vector<8x128xf32>
    %cst_8 = arith.constant dense<0.000000e+00> : vector<8x128xf32>
    %17 = tpu.matmul %13, %0, %cst_8 {dimension_numbers = #tpu.dot_dimension_numbers<[1], [0], [0], [1], [0, 0, 1, 1], [], []>} : vector<8x128xf32>, vector<128x128xf32>, vector<8x128xf32> -> vector<8x128xf32>
    %18 = arith.addf %16, %17 : vector<8x128xf32>
    %19 = math.tanh %18 : vector<8x128xf32>
    %20 = vector.broadcast %c1_i32 : i32 to vector<8x1xi32>
    %21 = arith.cmpi sgt, %1, %20 : vector<8x1xi32>
    %22 = vector.shape_cast %21 : vector<8x1xi1> to vector<8x1xi1>
    %23 = vector.broadcast %22 : vector<8x1xi1> to vector<8x128xi1>
    %24 = arith.select %23, %19, %13 : vector<8x128xi1>, vector<8x128xf32>
    %c2_i32 = arith.constant 2 : i32
    %25 = arith.index_cast %c2_i32 : i32 to index
    %c0_9 = arith.constant 0 : index
    %c0_10 = arith.constant 0 : index
    %26 = vector.load %arg0[%25, %c0_9, %c0_10] : memref<8x8x128xf32, #tpu.memory_space<vmem>>, vector<1x8x128xf32>
    %27 = vector.shape_cast %26 : vector<1x8x128xf32> to vector<8x128xf32>
    %cst_11 = arith.constant dense<0.000000e+00> : vector<8x128xf32>
    %28 = tpu.matmul %24, %0, %cst_11 {dimension_numbers = #tpu.dot_dimension_numbers<[1], [0], [0], [1], [0, 0, 1, 1], [], []>} : vector<8x128xf32>, vector<128x128xf32>, vector<8x128xf32> -> vector<8x128xf32>
    %29 = arith.addf %27, %28 : vector<8x128xf32>
    %30 = math.tanh %29 : vector<8x128xf32>
    %31 = vector.broadcast %c2_i32 : i32 to vector<8x1xi32>
    %32 = arith.cmpi sgt, %1, %31 : vector<8x1xi32>
    %33 = vector.shape_cast %32 : vector<8x1xi1> to vector<8x1xi1>
    %34 = vector.broadcast %33 : vector<8x1xi1> to vector<8x128xi1>
    %35 = arith.select %34, %30, %24 : vector<8x128xi1>, vector<8x128xf32>
    %c3_i32 = arith.constant 3 : i32
    %36 = arith.index_cast %c3_i32 : i32 to index
    %c0_12 = arith.constant 0 : index
    %c0_13 = arith.constant 0 : index
    %37 = vector.load %arg0[%36, %c0_12, %c0_13] : memref<8x8x128xf32, #tpu.memory_space<vmem>>, vector<1x8x128xf32>
    %38 = vector.shape_cast %37 : vector<1x8x128xf32> to vector<8x128xf32>
    %cst_14 = arith.constant dense<0.000000e+00> : vector<8x128xf32>
    %39 = tpu.matmul %35, %0, %cst_14 {dimension_numbers = #tpu.dot_dimension_numbers<[1], [0], [0], [1], [0, 0, 1, 1], [], []>} : vector<8x128xf32>, vector<128x128xf32>, vector<8x128xf32> -> vector<8x128xf32>
    %40 = arith.addf %38, %39 : vector<8x128xf32>
    %41 = math.tanh %40 : vector<8x128xf32>
    %42 = vector.broadcast %c3_i32 : i32 to vector<8x1xi32>
    %43 = arith.cmpi sgt, %1, %42 : vector<8x1xi32>
    %44 = vector.shape_cast %43 : vector<8x1xi1> to vector<8x1xi1>
    %45 = vector.broadcast %44 : vector<8x1xi1> to vector<8x128xi1>
    %46 = arith.select %45, %41, %35 : vector<8x128xi1>, vector<8x128xf32>
    %c4_i32 = arith.constant 4 : i32
    %47 = arith.index_cast %c4_i32 : i32 to index
    %c0_15 = arith.constant 0 : index
    %c0_16 = arith.constant 0 : index
    %48 = vector.load %arg0[%47, %c0_15, %c0_16] : memref<8x8x128xf32, #tpu.memory_space<vmem>>, vector<1x8x128xf32>
    %49 = vector.shape_cast %48 : vector<1x8x128xf32> to vector<8x128xf32>
    %cst_17 = arith.constant dense<0.000000e+00> : vector<8x128xf32>
    %50 = tpu.matmul %46, %0, %cst_17 {dimension_numbers = #tpu.dot_dimension_numbers<[1], [0], [0], [1], [0, 0, 1, 1], [], []>} : vector<8x128xf32>, vector<128x128xf32>, vector<8x128xf32> -> vector<8x128xf32>
    %51 = arith.addf %49, %50 : vector<8x128xf32>
    %52 = math.tanh %51 : vector<8x128xf32>
    %53 = vector.broadcast %c4_i32 : i32 to vector<8x1xi32>
    %54 = arith.cmpi sgt, %1, %53 : vector<8x1xi32>
    %55 = vector.shape_cast %54 : vector<8x1xi1> to vector<8x1xi1>
    %56 = vector.broadcast %55 : vector<8x1xi1> to vector<8x128xi1>
    %57 = arith.select %56, %52, %46 : vector<8x128xi1>, vector<8x128xf32>
    %c5_i32 = arith.constant 5 : i32
    %58 = arith.index_cast %c5_i32 : i32 to index
    %c0_18 = arith.constant 0 : index
    %c0_19 = arith.constant 0 : index
    %59 = vector.load %arg0[%58, %c0_18, %c0_19] : memref<8x8x128xf32, #tpu.memory_space<vmem>>, vector<1x8x128xf32>
    %60 = vector.shape_cast %59 : vector<1x8x128xf32> to vector<8x128xf32>
    %cst_20 = arith.constant dense<0.000000e+00> : vector<8x128xf32>
    %61 = tpu.matmul %57, %0, %cst_20 {dimension_numbers = #tpu.dot_dimension_numbers<[1], [0], [0], [1], [0, 0, 1, 1], [], []>} : vector<8x128xf32>, vector<128x128xf32>, vector<8x128xf32> -> vector<8x128xf32>
    %62 = arith.addf %60, %61 : vector<8x128xf32>
    %63 = math.tanh %62 : vector<8x128xf32>
    %64 = vector.broadcast %c5_i32 : i32 to vector<8x1xi32>
    %65 = arith.cmpi sgt, %1, %64 : vector<8x1xi32>
    %66 = vector.shape_cast %65 : vector<8x1xi1> to vector<8x1xi1>
    %67 = vector.broadcast %66 : vector<8x1xi1> to vector<8x128xi1>
    %68 = arith.select %67, %63, %57 : vector<8x128xi1>, vector<8x128xf32>
    %c6_i32 = arith.constant 6 : i32
    %69 = arith.index_cast %c6_i32 : i32 to index
    %c0_21 = arith.constant 0 : index
    %c0_22 = arith.constant 0 : index
    %70 = vector.load %arg0[%69, %c0_21, %c0_22] : memref<8x8x128xf32, #tpu.memory_space<vmem>>, vector<1x8x128xf32>
    %71 = vector.shape_cast %70 : vector<1x8x128xf32> to vector<8x128xf32>
    %cst_23 = arith.constant dense<0.000000e+00> : vector<8x128xf32>
    %72 = tpu.matmul %68, %0, %cst_23 {dimension_numbers = #tpu.dot_dimension_numbers<[1], [0], [0], [1], [0, 0, 1, 1], [], []>} : vector<8x128xf32>, vector<128x128xf32>, vector<8x128xf32> -> vector<8x128xf32>
    %73 = arith.addf %71, %72 : vector<8x128xf32>
    %74 = math.tanh %73 : vector<8x128xf32>
    %75 = vector.broadcast %c6_i32 : i32 to vector<8x1xi32>
    %76 = arith.cmpi sgt, %1, %75 : vector<8x1xi32>
    %77 = vector.shape_cast %76 : vector<8x1xi1> to vector<8x1xi1>
    %78 = vector.broadcast %77 : vector<8x1xi1> to vector<8x128xi1>
    %79 = arith.select %78, %74, %68 : vector<8x128xi1>, vector<8x128xf32>
    %c7_i32 = arith.constant 7 : i32
    %80 = arith.index_cast %c7_i32 : i32 to index
    %c0_24 = arith.constant 0 : index
    %c0_25 = arith.constant 0 : index
    %81 = vector.load %arg0[%80, %c0_24, %c0_25] : memref<8x8x128xf32, #tpu.memory_space<vmem>>, vector<1x8x128xf32>
    %82 = vector.shape_cast %81 : vector<1x8x128xf32> to vector<8x128xf32>
    %cst_26 = arith.constant dense<0.000000e+00> : vector<8x128xf32>
    %83 = tpu.matmul %79, %0, %cst_26 {dimension_numbers = #tpu.dot_dimension_numbers<[1], [0], [0], [1], [0, 0, 1, 1], [], []>} : vector<8x128xf32>, vector<128x128xf32>, vector<8x128xf32> -> vector<8x128xf32>
    %84 = arith.addf %82, %83 : vector<8x128xf32>
    %85 = math.tanh %84 : vector<8x128xf32>
    %86 = vector.broadcast %c7_i32 : i32 to vector<8x1xi32>
    %87 = arith.cmpi sgt, %1, %86 : vector<8x1xi32>
    %88 = vector.shape_cast %87 : vector<8x1xi1> to vector<8x1xi1>
    %89 = vector.broadcast %88 : vector<8x1xi1> to vector<8x128xi1>
    %90 = arith.select %89, %85, %79 : vector<8x128xi1>, vector<8x128xf32>
    %c8_i32 = arith.constant 8 : i32
    %c0_27 = arith.constant 0 : index
    %c0_28 = arith.constant 0 : index
    %91 = vector.load %arg3[%c0_27, %c0_28] : memref<128x128xf32, #tpu.memory_space<vmem>>, vector<128x128xf32>
    %cst_29 = arith.constant dense<0.000000e+00> : vector<8x128xf32>
    %92 = tpu.matmul %90, %91, %cst_29 {dimension_numbers = #tpu.dot_dimension_numbers<[1], [0], [0], [1], [0, 0, 1, 1], [], []>} : vector<8x128xf32>, vector<128x128xf32>, vector<8x128xf32> -> vector<8x128xf32>
    %c0_30 = arith.constant 0 : index
    %c0_31 = arith.constant 0 : index
    %93 = vector.load %arg4[%c0_30, %c0_31] : memref<1x128xf32, #tpu.memory_space<vmem>>, vector<1x128xf32>
    %94 = vector.broadcast %93 : vector<1x128xf32> to vector<8x128xf32>
    %95 = arith.addf %92, %94 : vector<8x128xf32>
    %96 = tpu.iota {dimensions = array<i32: 1>} : vector<8x128xi32>
    %c8_i32_32 = arith.constant 8 : i32
    %97 = vector.broadcast %c8_i32_32 : i32 to vector<8x128xi32>
    %98 = arith.cmpi slt, %96, %97 : vector<8x128xi32>
    %cst_33 = arith.constant -1.000000e+30 : f32
    %99 = vector.broadcast %cst_33 : f32 to vector<8x128xf32>
    %100 = arith.select %98, %95, %99 : vector<8x128xi1>, vector<8x128xf32>
    %cst_34 = arith.constant dense<0xFF800000> : vector<8xf32>
    %101 = vector.multi_reduction <maximumf>, %100, %cst_34 [1] : vector<8x128xf32> to vector<8xf32>
    %102 = vector.shape_cast %101 : vector<8xf32> to vector<8x1xf32>
    %103 = vector.broadcast %102 : vector<8x1xf32> to vector<8x128xf32>
    %104 = arith.subf %100, %103 : vector<8x128xf32>
    %105 = math.exp %104 : vector<8x128xf32>
    %cst_35 = arith.constant dense<0.000000e+00> : vector<8xf32>
    %106 = vector.multi_reduction <add>, %105, %cst_35 [1] : vector<8x128xf32> to vector<8xf32>
    %107 = vector.shape_cast %106 : vector<8xf32> to vector<8x1xf32>
    %108 = math.log %107 : vector<8x1xf32>
    %109 = vector.broadcast %108 : vector<8x1xf32> to vector<8x128xf32>
    %110 = arith.subf %104, %109 : vector<8x128xf32>
    %c0_36 = arith.constant 0 : index
    %c0_37 = arith.constant 0 : index
    %111 = vector.load %arg5[%c0_36, %c0_37] : memref<8x128xf32, #tpu.memory_space<vmem>>, vector<8x128xf32>
    tpu.vector_store %arg5[%c0_36, %c0_37], %110 {strides = array<i32>} : memref<8x128xf32, #tpu.memory_space<vmem>>, vector<8x128xf32>,
    return
  }
}

</mosaic_0001>

<bundles_post_ra>
// kernel: rnn_forward.1
= control target key start
LH: loop header
LB: loop body
LE: loop exit
PB: predicated region body
PF: predicated region fallthrough
CT: control target
= control target key end

     0   :  { %v1515_v0 = vmov 0.0|0.0   ;;  %vm1516_vm0 = vmmov 0   ;;  %v1517_v4 = vmov 0.0   ;;  %v1518_v7 = vmov 0   ;;  %s1869_s2 = inlined_call_operand.vmem [shape: f32[128,128], index: 2, kind: input, shape index: {}]   ;;  %s1870_s1 = inlined_call_operand.vmem [shape: s32[8,1], index: 1, kind: input, shape index: {}]   ;;  %s1871_s0 = inlined_call_operand.vmem [shape: f32[8,8,128], index: 0, kind: input, shape index: {}]   ;;  %s1872_s3 = inlined_call_operand.vmem [shape: f32[128,128], index: 3, kind: input, shape index: {}]   ;;  %s1873_s4 = inlined_call_operand.vmem [shape: f32[1,128], index: 4, kind: input, shape index: {}]   ;;  %s1874_s5 = inlined_call_operand.vmem [shape: f32[8,128], index: 5, kind: output, shape index: {}]  }
   0x1   :  { %1273 = vmatprep.subr.bf16.mxu0 %v1515_v0  ;;  %v20_v1 = vld [vmem:[%s1869_s2] sm:$0xff]  ;;  %v21_v2 = vld [vmem:[%s1869_s2 + $0x8] sm:$0xff]  ;;  %v22_v3 = vld [vmem:[%s1869_s2 + $0x10] sm:$0xff]  ;;  %990 = vmatprep.mubr.msk.f32.mxu0 %vm1516_vm0, %v1517_v4 }
   0x2   :  { %v1561_v5 = vpack.c.bf16 %v21_v2, %v20_v1  ;;  %v23_v6 = vld [vmem:[%s1869_s2 + $0x18] sm:$0xff]  ;;  %1493 = vset.pattern.permute.xlu0 %v1518_v7  ;;  %1297 = vmatprep.subr.bf16.mxu1 %v1515_v0  ;;  %v24_v9 = vld [vmem:[%s1869_s2 + $0x20] sm:$0xff]  ;;  %v25_v10 = vld [vmem:[%s1869_s2 + $0x28] sm:$0xff] }
   0x3   :  { %1025 = vmatprep.mubr.msk.f32.mxu1 %vm1516_vm0, %v1517_v4  ;;  %1494 = vset.pattern.permute.xlu1 %v1518_v7  ;;  %v1572_v8 = vpack.c.bf16 %v23_v6, %v22_v3  ;;  %v1586_v11 = vld [vmem:[%s1870_s1] sm:$0xff]  ;;  %v1591_v12 = vpack.c.bf16 %v25_v10, %v24_v9  ;;  %v26_v14 = vld [vmem:[%s1869_s2 + $0x30] sm:$0xff]  ;;  %v27_v15 = vld [vmem:[%s1869_s2 + $0x38] sm:$0xff] }
   0x4   :  { %1275 = vmatpush3.bf16.msra.mxu0 %v1561_v5  ;;  %1299 = vmatpush3.bf16.msra.mxu1 %v1561_v5  ;;  %vm110_vm1 = vcmp.gt.s32.totalorder %v1586_v11, 0  ;;  %vm191_vm2 = vcmp.gt.s32.totalorder %v1586_v11, 1  ;;  %vm434_vm3 = vcmp.gt.s32.totalorder %v1586_v11, 4  ;;  %v1606_v17 = vpack.c.bf16 %v27_v15, %v26_v14  ;;  %v28_v18 = vld [vmem:[%s1869_s2 + $0x40] sm:$0xff]  ;;  %v29_v19 = vld [vmem:[%s1869_s2 + $0x48] sm:$0xff]  ;;  %v30_v22 = vld [vmem:[%s1869_s2 + $0x50] sm:$0xff] }
   0x5   :  { %1276 = vmatprep.subr.bf16.mxu0 %v1515_v0  ;;  %1300 = vmatprep.subr.bf16.mxu1 %v1515_v0  ;;  %v111_v13 = vsel %vm110_vm1, 1, %v1518_v7  ;;  %v192_v16 = vsel %vm191_vm2, 1, %v1518_v7  ;;  %v435_v20 = vsel %vm434_vm3, 1, %v1518_v7  ;;  %vm596_vm4 = vcmp.gt.s32.totalorder %v1586_v11, 6  ;;  %v31_v23 = vld [vmem:[%s1869_s2 + $0x58] sm:$0xff]  ;;  %v32_v26 = vld [vmem:[%s1869_s2 + $0x60] sm:$0xff] }
   0x6   :  { %113 = vperm.xlu0 %1493, %v111_v13   ;;  %v1620_v21 = vpack.c.bf16 %v29_v19, %v28_v18  ;;  %v597_v24 = vsel %vm596_vm4, 1, %v1518_v7  ;;  %v1633_v25 = vpack.c.bf16 %v31_v23, %v30_v22  ;;  %v33_v27 = vld [vmem:[%s1869_s2 + $0x68] sm:$0xff]  ;;  %v34_v29 = vld [vmem:[%s1869_s2 + $0x70] sm:$0xff]  ;;  %v35_v30 = vld [vmem:[%s1869_s2 + $0x78] sm:$0xff]  ;;  %vm272_vm6 = vcmp.gt.s32.totalorder %v1586_v11, 2 }
   0x7   :  { %v1645_v28 = vpack.c.bf16 %v33_v27, %v32_v26  ;;  %v1657_v31 = vpack.c.bf16 %v35_v30, %v34_v29  ;;  %v37_v32 = vld [vmem:[%s1871_s0] sm:$0xff]  ;;  %vm353_vm7 = vcmp.gt.s32.totalorder %v1586_v11, 3  ;;  %v273_v39 = vsel %vm272_vm6, 1, %v1518_v7  ;;  %v796_v43 = vld [vmem:[%s1871_s0 + $0x8] sm:$0xff]  ;;  %v798_v50 = vld [vmem:[%s1871_s0 + $0x10] sm:$0xff] }
   0x8   :  { %1278 = vmatpush3.bf16.msra.mxu0 %v1572_v8  ;;  %1302 = vmatpush3.bf16.msra.mxu1 %v1572_v8  ;;  %v354_v40 = vsel %vm353_vm7, 1, %v1518_v7  ;;  %vm515_vm8 = vcmp.gt.s32.totalorder %v1586_v11, 5  ;;  %vm677_vm9 = vcmp.gt.s32.totalorder %v1586_v11, 7  ;;  %v799_v57 = vld [vmem:[%s1871_s0 + $0x18] sm:$0xff]  ;;  %v800_v1 = vld [vmem:[%s1871_s0 + $0x20] sm:$0xff]  ;;  %v686_v18 = vld [vmem:[%s1872_s3 + $0x10] sm:$0xff] }
   0x9   :  { %1279 = vmatprep.subr.bf16.mxu0 %v1515_v0  ;;  %1303 = vmatprep.subr.bf16.mxu1 %v1515_v0  ;;  %v516_v41 = vsel %vm515_vm8, 1, %v1518_v7  ;;  %v678_v42 = vsel %vm677_vm9, 1, %v1518_v7  ;;  %v689_v22 = vld [vmem:[%s1872_s3 + $0x28] sm:$0xff]  ;;  %v802_v27 = vld [vmem:[%s1871_s0 + $0x30] sm:$0xff] }
   0xa   :  { %194 = vperm.xlu0 %1493, %v192_v16   ;;  %275 = vperm.xlu1 %1494, %v273_v39   ;;  %v684_v16 = vld [vmem:[%s1872_s3] sm:$0xff] }
   0xc   :  { %1281 = vmatpush3.bf16.msra.mxu0 %v1591_v12  ;;  %1305 = vmatpush3.bf16.msra.mxu1 %v1591_v12 }
   0xd   :  { %1282 = vmatprep.subr.bf16.mxu0 %v1515_v0  ;;  %1306 = vmatprep.subr.bf16.mxu1 %v1515_v0 }
   0xe   :  { %437 = vperm.xlu0 %1493, %v435_v20   ;;  %356 = vperm.xlu1 %1494, %v354_v40   ;;  %v687_v20 = vld [vmem:[%s1872_s3 + $0x18] sm:$0xff]  ;;  %v696_v40 = vld [vmem:[%s1872_s3 + $0x60] sm:$0xff] }
  0x10   :  { %1284 = vmatpush3.bf16.msra.mxu0 %v1606_v17  ;;  %1308 = vmatpush3.bf16.msra.mxu1 %v1606_v17 }
  0x11   :  { %1285 = vmatprep.subr.bf16.mxu0 %v1515_v0  ;;  %1309 = vmatprep.subr.bf16.mxu1 %v1515_v0 }
  0x12   :  { %599 = vperm.xlu0 %1493, %v597_v24   ;;  %518 = vperm.xlu1 %1494, %v516_v41   ;;  %v690_v24 = vld [vmem:[%s1872_s3 + $0x30] sm:$0xff]  ;;  %v697_v41 = vld [vmem:[%s1872_s3 + $0x68] sm:$0xff] }
  0x14   :  { %1287 = vmatpush3.bf16.msra.mxu0 %v1620_v21  ;;  %1311 = vmatpush3.bf16.msra.mxu1 %v1620_v21 }
  0x15   :  { %1288 = vmatprep.subr.bf16.mxu0 %v1515_v0  ;;  %1312 = vmatprep.subr.bf16.mxu1 %v1515_v0 }
  0x16   :  { %680 = vperm.xlu1 %1494, %v678_v42   ;;  %v1484_v42 = vpack.c.bf16 %v697_v41, %v696_v40 }
  0x18   :  { %1290 = vmatpush3.bf16.msra.mxu0 %v1633_v25  ;;  %1314 = vmatpush3.bf16.msra.mxu1 %v1633_v25 }
  0x19   :  { %1291 = vmatprep.subr.bf16.mxu0 %v1515_v0  ;;  %1315 = vmatprep.subr.bf16.mxu1 %v1515_v0 }
  0x1c   :  { %1293 = vmatpush3.bf16.msra.mxu0 %v1645_v28  ;;  %1317 = vmatpush3.bf16.msra.mxu1 %v1645_v28 }
  0x1d   :  { %1294 = vmatprep.subr.bf16.mxu0 %v1515_v0  ;;  %1318 = vmatprep.subr.bf16.mxu1 %v1515_v0 }
  0x20   :  { %1296 = vmatpush3.bf16.msra.mxu0 %v1657_v31  ;;  %1320 = vmatpush3.bf16.msra.mxu1 %v1657_v31 }
  0x21   :  { %1321 = vmatprep.subr.bf16.mxu0 %v1515_v0  ;;  %1345 = vmatprep.subr.bf16.mxu1 %v1515_v0 }
  0x23   :  { %991 = vmatmul.mubr.f32.vlgmr.msra.gmra.mrb[0].mxu0 %v1517_v4 }
  0x24   :  { %1323 = vmatpush3.bf16.msra.mxu0 %v1561_v5  ;;  %1060 = vmatprep.mubr.msk.f32.mxu0 %vm1516_vm0, %v1517_v4 }
  0x25   :  { %1324 = vmatprep.subr.bf16.mxu0 %v1515_v0 }
  0x28   :  { %1326 = vmatpush3.bf16.msra.mxu0 %v1572_v8 }
  0x29   :  { %1327 = vmatprep.subr.bf16.mxu0 %v1515_v0 }
  0x2c   :  { %1329 = vmatpush3.bf16.msra.mxu0 %v1591_v12 }
  0x2d   :  { %1330 = vmatprep.subr.bf16.mxu0 %v1515_v0 }
  0x30   :  { %1332 = vmatpush3.bf16.msra.mxu0 %v1606_v17 }
  0x31   :  { %1333 = vmatprep.subr.bf16.mxu0 %v1515_v0 }
  0x34   :  { %1335 = vmatpush3.bf16.msra.mxu0 %v1620_v21 }
  0x35   :  { %1336 = vmatprep.subr.bf16.mxu0 %v1515_v0 }
  0x38   :  { %1338 = vmatpush3.bf16.msra.mxu0 %v1633_v25 }
  0x39   :  { %1339 = vmatprep.subr.bf16.mxu0 %v1515_v0 }
  0x3c   :  { %1341 = vmatpush3.bf16.msra.mxu0 %v1645_v28 }
  0x3d   :  { %1342 = vmatprep.subr.bf16.mxu0 %v1515_v0 }
  0x40   :  { %1344 = vmatpush3.bf16.msra.mxu0 %v1657_v31 }
  0x41   :  { %1369 = vmatprep.subr.bf16.mxu0 %v1515_v0 }
  0x85   :  { %v114_v36 = vpop.permute.xlu0 %113 }
  0x86   :  { %vm115_vm5 = vcmp.eq.s32.totalorder %v114_v36, 1 }
  0x89   :  { %v195_v47 = vpop.permute.xlu0 %194  ;;  %v276_v54 = vpop.permute.xlu1 %275 }
  0x8a   :  { %vm196_vm10 = vcmp.eq.s32.totalorder %v195_v47, 1  ;;  %vm277_vm11 = vcmp.eq.s32.totalorder %v276_v54, 1 }
  0x8d   :  { %v357_v61 = vpop.permute.xlu1 %356  ;;  %v438_v7 = vpop.permute.xlu0 %437 }
  0x8e   :  { %vm358_vm12 = vcmp.eq.s32.totalorder %v357_v61, 1  ;;  %vm439_vm13 = vcmp.eq.s32.totalorder %v438_v7, 1 }
  0x91   :  { %v519_v13 = vpop.permute.xlu1 %518 }
  0x92   :  { %vm520_vm14 = vcmp.eq.s32.totalorder %v519_v13, 1 }
  0xf6   :  { %v104_v33 = vpop.f32.mrb[0].mxu0 }
  0xf7   :  { %v108_v34 = vadd.f32 %v104_v33, %v37_v32  ;;  %v992_v35 = vpop.f32.mrb[1].mxu0 }
  0xf8   :  { %v693_v35 = vld [vmem:[%s1872_s3 + $0x48] sm:$0xff] }
  0xf9   :  { %1495 = vtanh.f32 %v108_v34  ;;  %v692_v34 = vld [vmem:[%s1872_s3 + $0x40] sm:$0xff] }
  0xfa   :  { %v1478_v36 = vpack.c.bf16 %v693_v35, %v692_v34 }
 0x103   :  { %v1496_v37 = vpop.eup %1495 }
 0x104   :  { %v116_v38 = vsel %vm115_vm5, %v1496_v37, 0.0  ;;  %1026 = vmatmul.mubr.msk.f32.vlgmr.msra.gmra.mrb[0].mxu1 %vm115_vm5, %v1496_v37  ;;  %v694_v37 = vld [vmem:[%s1872_s3 + $0x50] sm:$0xff] }
 0x105   :  { %1347 = vmatpush3.bf16.msra.mxu1 %v1561_v5  ;;  %1095 = vmatprep.mubr.msk.f32.mxu1 %vm1516_vm0, %v1517_v4 }
 0x106   :  { %1348 = vmatprep.subr.bf16.mxu1 %v1515_v0 }
 0x109   :  { %1350 = vmatpush3.bf16.msra.mxu1 %v1572_v8 }
 0x10a   :  { %1351 = vmatprep.subr.bf16.mxu1 %v1515_v0 }
 0x10d   :  { %1353 = vmatpush3.bf16.msra.mxu1 %v1591_v12 }
 0x10e   :  { %1354 = vmatprep.subr.bf16.mxu1 %v1515_v0 }
 0x111   :  { %1356 = vmatpush3.bf16.msra.mxu1 %v1606_v17 }
 0x112   :  { %1357 = vmatprep.subr.bf16.mxu1 %v1515_v0 }
 0x115   :  { %1359 = vmatpush3.bf16.msra.mxu1 %v1620_v21 }
 0x116   :  { %1360 = vmatprep.subr.bf16.mxu1 %v1515_v0 }
 0x119   :  { %1362 = vmatpush3.bf16.msra.mxu1 %v1633_v25 }
 0x11a   :  { %1363 = vmatprep.subr.bf16.mxu1 %v1515_v0 }
 0x11d   :  { %1365 = vmatpush3.bf16.msra.mxu1 %v1645_v28 }
 0x11e   :  { %1366 = vmatprep.subr.bf16.mxu1 %v1515_v0 }
 0x121   :  { %1368 = vmatpush3.bf16.msra.mxu1 %v1657_v31 }
 0x122   :  { %1393 = vmatprep.subr.bf16.mxu1 %v1515_v0 }
 0x1d7   :  { %v185_v44 = vpop.f32.mrb[0].mxu1 }
 0x1d8   :  { %v189_v45 = vadd.f32 %v796_v43, %v185_v44  ;;  %v1027_v46 = vpop.f32.mrb[1].mxu1  ;;  %v698_v43 = vld [vmem:[%s1872_s3 + $0x70] sm:$0xff]  ;;  %v699_v44 = vld [vmem:[%s1872_s3 + $0x78] sm:$0xff] }
 0x1d9   :  { %v803_v46 = vld [vmem:[%s1871_s0 + $0x38] sm:$0xff] }
 0x1da   :  { %1497 = vtanh.f32 %v189_v45  ;;  %v1487_v45 = vpack.c.bf16 %v699_v44, %v698_v43 }
 0x1e4   :  { %v1498_v48 = vpop.eup %1497 }
 0x1e5   :  { %v197_v49 = vsel %vm196_vm10, %v1498_v48, %v116_v38  ;;  %v695_v38 = vld [vmem:[%s1872_s3 + $0x58] sm:$0xff] }
 0x1e6   :  { %1061 = vmatmul.mubr.f32.vlgmr.msra.gmra.mrb[2].mxu0 %v197_v49  ;;  %v1481_v39 = vpack.c.bf16 %v695_v38, %v694_v37 }
 0x1e7   :  { %1371 = vmatpush3.bf16.msra.mxu0 %v1561_v5  ;;  %1130 = vmatprep.mubr.msk.f32.mxu0 %vm1516_vm0, %v1517_v4 }
 0x1e8   :  { %1372 = vmatprep.subr.bf16.mxu0 %v1515_v0 }
 0x1eb   :  { %1374 = vmatpush3.bf16.msra.mxu0 %v1572_v8 }
 0x1ec   :  { %1375 = vmatprep.subr.bf16.mxu0 %v1515_v0 }
 0x1ef   :  { %1377 = vmatpush3.bf16.msra.mxu0 %v1591_v12 }
 0x1f0   :  { %1378 = vmatprep.subr.bf16.mxu0 %v1515_v0 }
 0x1f3   :  { %1380 = vmatpush3.bf16.msra.mxu0 %v1606_v17 }
 0x1f4   :  { %1381 = vmatprep.subr.bf16.mxu0 %v1515_v0 }
 0x1f7   :  { %1383 = vmatpush3.bf16.msra.mxu0 %v1620_v21 }
 0x1f8   :  { %1384 = vmatprep.subr.bf16.mxu0 %v1515_v0 }
 0x1fb   :  { %1386 = vmatpush3.bf16.msra.mxu0 %v1633_v25 }
 0x1fc   :  { %1387 = vmatprep.subr.bf16.mxu0 %v1515_v0 }
 0x1ff   :  { %1389 = vmatpush3.bf16.msra.mxu0 %v1645_v28 }
 0x200   :  { %1390 = vmatprep.subr.bf16.mxu0 %v1515_v0 }
 0x203   :  { %1392 = vmatpush3.bf16.msra.mxu0 %v1657_v31 }
 0x204   :  { %1417 = vmatprep.subr.bf16.mxu0 %v1515_v0 }
 0x2b9   :  { %v266_v51 = vpop.f32.mrb[2].mxu0 }
 0x2ba   :  { %v270_v52 = vadd.f32 %v798_v50, %v266_v51  ;;  %v1062_v53 = vpop.f32.mrb[3].mxu0  ;;  %v681_v50 = vpop.permute.xlu1 %680 }
 0x2bb   :  { %v777_v53 = vlaneseq }
 0x2bc   :  { %1499 = vtanh.f32 %v270_v52 }
 0x2bd   :  { %v778_v54 = vand.u32 127, %v777_v53 }
 0x2bf   :  { %vm779_vm1 = vcmp.lt.s32.totalorder %v778_v54, 8 }
 0x2c6   :  { %v1500_v55 = vpop.eup %1499 }
 0x2c7   :  { %v278_v56 = vsel %vm277_vm11, %v1500_v55, %v197_v49 }
 0x2c8   :  { %1096 = vmatmul.mubr.f32.vlgmr.msra.gmra.mrb[2].mxu1 %v278_v56 }
 0x2c9   :  { %1395 = vmatpush3.bf16.msra.mxu1 %v1561_v5  ;;  %1165 = vmatprep.mubr.msk.f32.mxu1 %vm1516_vm0, %v1517_v4 }
 0x2ca   :  { %1396 = vmatprep.subr.bf16.mxu1 %v1515_v0 }
 0x2cd   :  { %1398 = vmatpush3.bf16.msra.mxu1 %v1572_v8 }
 0x2ce   :  { %1399 = vmatprep.subr.bf16.mxu1 %v1515_v0 }
 0x2d1   :  { %1401 = vmatpush3.bf16.msra.mxu1 %v1591_v12 }
 0x2d2   :  { %1402 = vmatprep.subr.bf16.mxu1 %v1515_v0 }
 0x2d5   :  { %1404 = vmatpush3.bf16.msra.mxu1 %v1606_v17 }
 0x2d6   :  { %1405 = vmatprep.subr.bf16.mxu1 %v1515_v0 }
 0x2d9   :  { %1407 = vmatpush3.bf16.msra.mxu1 %v1620_v21 }
 0x2da   :  { %1408 = vmatprep.subr.bf16.mxu1 %v1515_v0 }
 0x2dd   :  { %1410 = vmatpush3.bf16.msra.mxu1 %v1633_v25 }
 0x2de   :  { %1411 = vmatprep.subr.bf16.mxu1 %v1515_v0 }
 0x2e1   :  { %1413 = vmatpush3.bf16.msra.mxu1 %v1645_v28 }
 0x2e2   :  { %1414 = vmatprep.subr.bf16.mxu1 %v1515_v0 }
 0x2e5   :  { %1416 = vmatpush3.bf16.msra.mxu1 %v1657_v31 }
 0x2e6   :  { %1441 = vmatprep.subr.bf16.mxu1 %v1515_v0 }
 0x39b   :  { %v347_v58 = vpop.f32.mrb[2].mxu1 }
 0x39c   :  { %v351_v59 = vadd.f32 %v799_v57, %v347_v58  ;;  %v1097_v60 = vpop.f32.mrb[3].mxu1 }
 0x39e   :  { %1501 = vtanh.f32 %v351_v59 }
 0x3a8   :  { %v1502_v62 = vpop.eup %1501 }
 0x3a9   :  { %v359_v63 = vsel %vm358_vm12, %v1502_v62, %v278_v56 }
 0x3aa   :  { %1131 = vmatmul.mubr.f32.vlgmr.msra.gmra.mrb[4].mxu0 %v359_v63 }
 0x3ab   :  { %1419 = vmatpush3.bf16.msra.mxu0 %v1561_v5  ;;  %1200 = vmatprep.mubr.msk.f32.mxu0 %vm1516_vm0, %v1517_v4 }
 0x3ac   :  { %1420 = vmatprep.subr.bf16.mxu0 %v1515_v0 }
 0x3af   :  { %1422 = vmatpush3.bf16.msra.mxu0 %v1572_v8 }
 0x3b0   :  { %1423 = vmatprep.subr.bf16.mxu0 %v1515_v0 }
 0x3b3   :  { %1425 = vmatpush3.bf16.msra.mxu0 %v1591_v12 }
 0x3b4   :  { %1426 = vmatprep.subr.bf16.mxu0 %v1515_v0 }
 0x3b7   :  { %1428 = vmatpush3.bf16.msra.mxu0 %v1606_v17 }
 0x3b8   :  { %1429 = vmatprep.subr.bf16.mxu0 %v1515_v0 }
 0x3bb   :  { %1431 = vmatpush3.bf16.msra.mxu0 %v1620_v21 }
 0x3bc   :  { %1432 = vmatprep.subr.bf16.mxu0 %v1515_v0 }
 0x3bf   :  { %1434 = vmatpush3.bf16.msra.mxu0 %v1633_v25 }
 0x3c0   :  { %1435 = vmatprep.subr.bf16.mxu0 %v1515_v0 }
 0x3c3   :  { %1437 = vmatpush3.bf16.msra.mxu0 %v1645_v28 }
 0x3c4   :  { %1438 = vmatprep.subr.bf16.mxu0 %v1515_v0 }
 0x3c7   :  { %1440 = vmatpush3.bf16.msra.mxu0 %v1657_v31 }
 0x3c8   :  { %1465 = vmatprep.subr.bf16.mxu0 %v1515_v0 }
 0x47d   :  { %v428_v2 = vpop.f32.mrb[4].mxu0 }
 0x47e   :  { %v432_v3 = vadd.f32 %v800_v1, %v428_v2  ;;  %v1132_v6 = vpop.f32.mrb[5].mxu0 }
 0x480   :  { %1503 = vtanh.f32 %v432_v3 }
 0x48a   :  { %v1504_v9 = vpop.eup %1503 }
 0x48b   :  { %v440_v10 = vsel %vm439_vm13, %v1504_v9, %v359_v63 }
 0x48c   :  { %1166 = vmatmul.mubr.f32.vlgmr.msra.gmra.mrb[4].mxu1 %v440_v10 }
 0x48d   :  { %1443 = vmatpush3.bf16.msra.mxu1 %v1561_v5  ;;  %1235 = vmatprep.mubr.msk.f32.mxu1 %vm1516_vm0, %v1517_v4  ;;  %v801_v5 = vld [vmem:[%s1871_s0 + $0x28] sm:$0xff] }
 0x48e   :  { %1444 = vmatprep.subr.bf16.mxu1 %v1515_v0 }
 0x491   :  { %1446 = vmatpush3.bf16.msra.mxu1 %v1572_v8 }
 0x492   :  { %1447 = vmatprep.subr.bf16.mxu1 %v1515_v0 }
 0x495   :  { %1449 = vmatpush3.bf16.msra.mxu1 %v1591_v12 }
 0x496   :  { %1450 = vmatprep.subr.bf16.mxu1 %v1515_v0 }
 0x499   :  { %1452 = vmatpush3.bf16.msra.mxu1 %v1606_v17  ;;  %v685_v17 = vld [vmem:[%s1872_s3 + $0x8] sm:$0xff] }
 0x49a   :  { %1453 = vmatprep.subr.bf16.mxu1 %v1515_v0  ;;  %v1466_v19 = vpack.c.bf16 %v685_v17, %v684_v16 }
 0x49d   :  { %1455 = vmatpush3.bf16.msra.mxu1 %v1620_v21  ;;  %v1469_v21 = vpack.c.bf16 %v687_v20, %v686_v18 }
 0x49e   :  { %1456 = vmatprep.subr.bf16.mxu1 %v1515_v0 }
 0x4a1   :  { %1458 = vmatpush3.bf16.msra.mxu1 %v1633_v25  ;;  %v691_v25 = vld [vmem:[%s1872_s3 + $0x38] sm:$0xff] }
 0x4a2   :  { %1459 = vmatprep.subr.bf16.mxu1 %v1515_v0  ;;  %v1475_v26 = vpack.c.bf16 %v691_v25, %v690_v24 }
 0x4a5   :  { %1461 = vmatpush3.bf16.msra.mxu1 %v1645_v28 }
 0x4a6   :  { %1462 = vmatprep.subr.bf16.mxu1 %v1515_v0 }
 0x4a9   :  { %1464 = vmatpush3.bf16.msra.mxu1 %v1657_v31  ;;  %v600_v31 = vpop.permute.xlu0 %599 }
 0x4aa   :  { %vm601_vm15 = vcmp.eq.s32.totalorder %v600_v31, 1 }
 0x55f   :  { %v509_v8 = vpop.f32.mrb[4].mxu1 }
 0x560   :  { %v513_v11 = vadd.f32 %v801_v5, %v509_v8  ;;  %v1167_v12 = vpop.f32.mrb[5].mxu1 }
 0x562   :  { %1505 = vtanh.f32 %v513_v11 }
 0x56c   :  { %v1506_v14 = vpop.eup %1505 }
 0x56d   :  { %v521_v15 = vsel %vm520_vm14, %v1506_v14, %v440_v10 }
 0x56e   :  { %1201 = vmatmul.mubr.f32.vlgmr.msra.gmra.mrb[6].mxu0 %v521_v15 }
 0x56f   :  { %1270 = vmatprep.mubr.msk.f32.mxu0 %vm1516_vm0, %v1517_v4  ;;  %1467 = vmatpush3.bf16.msra.mxu0 %v1466_v19  ;;  %v688_v4 = vld [vmem:[%s1872_s3 + $0x20] sm:$0xff]  ;;  %vm682_vm0 = vcmp.eq.s32.totalorder %v681_v50, 1 }
 0x570   :  { %1468 = vmatprep.subr.bf16.mxu0 %v1515_v0  ;;  %v1472_v23 = vpack.c.bf16 %v689_v22, %v688_v4 }
 0x573   :  { %1470 = vmatpush3.bf16.msra.mxu0 %v1469_v21 }
 0x574   :  { %1471 = vmatprep.subr.bf16.mxu0 %v1515_v0 }
 0x577   :  { %1473 = vmatpush3.bf16.msra.mxu0 %v1472_v23 }
 0x578   :  { %1474 = vmatprep.subr.bf16.mxu0 %v1515_v0 }
 0x57b   :  { %1476 = vmatpush3.bf16.msra.mxu0 %v1475_v26 }
 0x57c   :  { %1477 = vmatprep.subr.bf16.mxu0 %v1515_v0 }
 0x57f   :  { %1479 = vmatpush3.bf16.msra.mxu0 %v1478_v36 }
 0x580   :  { %1480 = vmatprep.subr.bf16.mxu0 %v1515_v0 }
 0x583   :  { %1482 = vmatpush3.bf16.msra.mxu0 %v1481_v39 }
 0x584   :  { %1483 = vmatprep.subr.bf16.mxu0 %v1515_v0 }
 0x587   :  { %1485 = vmatpush3.bf16.msra.mxu0 %v1484_v42 }
 0x588   :  { %1486 = vmatprep.subr.bf16.mxu0 %v1515_v0  ;;  %v804_v0 = vld [vmem:[%s1873_s4] ss:$0 sm:$0xff] }
 0x58b   :  { %1488 = vmatpush3.bf16.msra.mxu0 %v1487_v45 }
 0x641   :  { %v590_v28 = vpop.f32.mrb[6].mxu0 }
 0x642   :  { %v594_v29 = vadd.f32 %v802_v27, %v590_v28  ;;  %v1202_v30 = vpop.f32.mrb[7].mxu0 }
 0x644   :  { %1507 = vtanh.f32 %v594_v29 }
 0x64e   :  { %v1508_v32 = vpop.eup %1507 }
 0x64f   :  { %v602_v33 = vsel %vm601_vm15, %v1508_v32, %v521_v15 }
 0x650   :  { %1236 = vmatmul.mubr.f32.vlgmr.msra.gmra.mrb[6].mxu1 %v602_v33 }
 0x723   :  { %v671_v47 = vpop.f32.mrb[6].mxu1 }
 0x724   :  { %v675_v48 = vadd.f32 %v803_v46, %v671_v47  ;;  %v1237_v49 = vpop.f32.mrb[7].mxu1 }
 0x726   :  { %1509 = vtanh.f32 %v675_v48 }
 0x730   :  { %v1510_v51 = vpop.eup %1509 }
 0x731   :  { %v683_v52 = vsel %vm682_vm0, %v1510_v51, %v602_v33 }
 0x732   :  { %1271 = vmatmul.mubr.f32.vlgmr.msra.gmra.mrb[8].mxu0 %v683_v52 }
 0x805   :  { %v773_v55 = vpop.f32.mrb[8].mxu0 }
 0x806   :  { %v774_v56 = vadd.f32 %v804_v0, %v773_v55  ;;  %v1272_v57 = vpop.f32.mrb[9].mxu0 }
 0x808   :  { %v780_v58 = vsel %vm779_vm1, %v774_v56, -1e+30 }
 0x809   :  { %781 = vmax.xlane.f32.xlu0 %v780_v58 }
 0x896   :  { %v782_v59 = vpop.xlane.xlu0 %781 }
 0x897   :  { %v783_v60 = vsub.f32 %v780_v58, %v782_v59 }
 0x899   :  { %v784_v61 = vmul.f32 1.442695, %v783_v60 }
 0x89b   :  { %1511 = vpow2.f32 %v784_v61 }
 0x8a5   :  { %v1512_v62 = vpop.eup %1511 }
 0x8a6   :  { %786 = vadd.xlane.f32.xlu1 %v1512_v62 }
 0x933   :  { %v787_v63 = vpop.xlane.xlu1 %786 }
 0x934   :  { %1513 = vlog2.f32 %v787_v63 }
 0x93e   :  { %v1514_v1 = vpop.eup %1513 }
 0x93f   :  { %v789_v2 = vmul.f32 0.6931472, %v1514_v1 }
 0x941   :  { %v790_v3 = vsub.f32 %v783_v60, %v789_v2 }
 0x943   :  { %791 = vst [vmem:[%s1874_s5] sm:$0xff] %v790_v3 }

</bundles_post_ra>
